<compile_context>
chip_gen: v6e
topology: v6e:2x2x1
jax: 0.10.0
libtpu: 0.0.40
codegen_flags: <defaults>
</compile_context>

<pallas_src>
import jax
import jax.numpy as jnp
import numpy as np
from jax.experimental import pallas as pl
from jax.experimental.pallas import tpu as pltpu

_LANE = 128
_SUBLANE = 8


def _round_up(x, m):
    return ((x + m - 1) // m) * m


def _make_mlp_kernel(num_weighted, has_bias, in_dim, out_dim, use_in_scratch):
    """Build the fused-MLP kernel body.

    Kernel refs: [x_ref, *param_refs, o_ref] (+ [xpad_scratch] if use_in_scratch).
    Every layer except the last applies tanh; the last layer is bias-free
    (matching `output_layer = nn.Linear(hidden, 1, bias=False)`).
    """

    def kernel(*refs):
        if use_in_scratch:
            x_ref, o_ref, xpad = refs[0], refs[-2], refs[-1]
            param_refs = refs[1:-2]
            # Zero-extend the real in_dim columns to the lane-padded width in VMEM.
            xpad[...] = jnp.zeros_like(xpad)
            xpad[:, :in_dim] = x_ref[...].astype(xpad.dtype)
            h = xpad[...]
        else:
            x_ref, o_ref = refs[0], refs[-1]
            param_refs = refs[1:-1]
            h = x_ref[...]

        p = 0
        for li in range(num_weighted):
            w = param_refs[p][...]
            p += 1
            # MXU matmul, f32 accumulation (operands are compute_dtype).
            h = jnp.dot(h.astype(w.dtype), w, preferred_element_type=jnp.float32)
            if has_bias[li]:
                h = h + param_refs[p][...].astype(jnp.float32)
                p += 1
            if li < num_weighted - 1:
                h = jnp.tanh(h)  # EUP; f32

        # Keep only the real output columns (out_dim=1 -> masked vst, but the HBM
        # write stream stays unpadded, which dominates on a mem-bound kernel).
        o_ref[...] = h[:, :out_dim].astype(o_ref.dtype)

    return kernel


def mlp_forward_pallas(x, weights_t, biases, *, batch_tile=512,
                       compute_dtype=jnp.float32):
    """Run the fused MLP kernel.

    x:         (batch, in_channels) float array
    weights_t: list of (in_dim, out_dim) float32 arrays (already transposed)
    biases:    list of (1, out_dim) float32 arrays or None (same length as weights_t)
    """
    batch, in_dim = x.shape
    out_dim = weights_t[-1].shape[1]
    num_weighted = len(weights_t)
    has_bias = tuple(b is not None for b in biases)

    # ---- tile geometry ---------------------------------------------------------
    in_pad = _round_up(in_dim, _LANE)
    use_in_scratch = in_pad != in_dim

    if batch <= _SUBLANE:
        tb = _SUBLANE
    else:
        # Cap tb so the grid has >= 2 steps (lets v7x shard batch tiles across both
        # TensorCores); batch_tile=512 keeps per-step overhead amortized.
        tb = min(_round_up(batch_tile, _SUBLANE),
                 _round_up(pl.cdiv(batch, 2), _SUBLANE))
        tb = max(tb, _SUBLANE)
    grid = (pl.cdiv(batch, tb),)

    if x.dtype != compute_dtype:
        x = x.astype(compute_dtype)

    # ---- weights / biases: pad to lane multiples (tiny, VMEM-resident) ----------
    # Zero padding is exact: tanh(0)=0 and padded columns never reach the real output.
    flat_params = []
    real_param_bytes = 0
    max_feat_pad = in_pad
    for w, b in zip(weights_t, biases):
        di, do = w.shape
        dip, dop = _round_up(di, _LANE), _round_up(do, _LANE)
        max_feat_pad = max(max_feat_pad, dop)
        w_p = jnp.zeros((dip, dop), compute_dtype).at[:di, :do].set(
            w.astype(compute_dtype))
        flat_params.append(w_p)
        real_param_bytes += di * do * jnp.dtype(compute_dtype).itemsize
        if b is not None:
            b_p = jnp.zeros((1, dop), jnp.float32).at[:, :do].set(
                b.astype(jnp.float32))
            flat_params.append(b_p)
            real_param_bytes += do * 4

    kernel = _make_mlp_kernel(num_weighted, has_bias, in_dim, out_dim,
                              use_in_scratch)

    # ---- specs -------------------------------------------------------------------
    # x / out stream at their TRUE widths (last block dim == full array dim is legal).
    x_spec = pl.BlockSpec((tb, in_dim), lambda i: (i, 0))
    param_specs = [pl.BlockSpec(p.shape, lambda i: (0, 0)) for p in flat_params]
    out_spec = pl.BlockSpec((tb, out_dim), lambda i: (i, 0))

    scratch_shapes = []
    if use_in_scratch:
        scratch_shapes.append(pltpu.VMEM((tb, in_pad), compute_dtype))

    # ---- VMEM budget (right-sized, unpadded streaming footprint) ------------------
    itemsize = jnp.dtype(compute_dtype).itemsize
    padded_param_bytes = sum(int(np.prod(p.shape)) * p.dtype.itemsize
                             for p in flat_params)
    tile_io_bytes = tb * (in_dim * itemsize + out_dim * 4)
    scratch_bytes = tb * in_pad * itemsize if use_in_scratch else 0
    interm_bytes = 3 * tb * max_feat_pad * 4     # headroom for wide intermediates/spills
    vmem_est = 2 * (padded_param_bytes + tile_io_bytes) + scratch_bytes + interm_bytes
    vmem_limit = int(min(max(2 * vmem_est + (2 << 20), 8 << 20), 64 << 20))

    # ---- cost estimate from true (unpadded) dims -----------------------------------
    flops = 2 * batch * sum(int(w.shape[0]) * int(w.shape[1]) for w in weights_t)
    transc = batch * sum(int(w.shape[1]) for w in weights_t[:-1])
    bytes_accessed = (batch * in_dim * itemsize + real_param_bytes
                      + batch * out_dim * 4)
    cost = pl.CostEstimate(flops=flops, transcendentals=transc,
                           bytes_accessed=bytes_accessed)

    out = pl.pallas_call(
        kernel,
        out_shape=jax.ShapeDtypeStruct((batch, out_dim), jnp.float32),
        grid=grid,
        in_specs=[x_spec] + param_specs,
        out_specs=out_spec,
        scratch_shapes=scratch_shapes,
        compiler_params=pltpu.CompilerParams(
            dimension_semantics=("parallel",),
            vmem_limit_bytes=vmem_limit),
        cost_estimate=cost,
    )(x, *flat_params)

    return out


def init_mlp_params(key, in_channels, num_layers, hidden_channels, std=1.0):
    """Deterministic init matching MLP.init_params (normal draws, same stds)."""
    sigma_w = std
    sigma_b = std
    tmp = sigma_w / np.sqrt(hidden_channels)

    keys = jax.random.split(key, 2 * num_layers)
    ki = 0
    weights_t, biases = [], []

    # in_layer: Linear(in_channels, hidden_channels, bias=True)
    w = jax.random.normal(keys[ki], (in_channels, hidden_channels), jnp.float32) * (
        sigma_w / np.sqrt(in_channels))
    ki += 1
    b = jax.random.normal(keys[ki], (1, hidden_channels), jnp.float32) * sigma_b
    ki += 1
    weights_t.append(w)
    biases.append(b)

    # hidden_layers: (num_layers - 2) x Linear(hidden, hidden, bias=True)
    for _ in range(num_layers - 2):
        w = jax.random.normal(keys[ki], (hidden_channels, hidden_channels),
                              jnp.float32) * tmp
        ki += 1
        b = jax.random.normal(keys[ki], (1, hidden_channels), jnp.float32) * sigma_b
        ki += 1
        weights_t.append(w)
        biases.append(b)

    # output_layer: Linear(hidden, 1, bias=False)
    w = jax.random.normal(keys[ki], (hidden_channels, 1), jnp.float32) * tmp
    ki += 1
    weights_t.append(w)
    biases.append(None)

    return weights_t, biases


def mlp_forward_ref(x, weights_t, biases):
    """Pure-JAX reference for correctness checking."""
    h = x
    n = len(weights_t)
    for i, (w, b) in enumerate(zip(weights_t, biases)):
        h = h @ w
        if b is not None:
            h = h + b
        if i < n - 1:
            h = jnp.tanh(h)
    return h


if __name__ == "__main__":
    key = jax.random.PRNGKey(0)
    k_params, k_x = jax.random.split(key)

    in_channels = 4
    num_layers = 3          # in_layer + 1 hidden layer + output layer
    hidden_channels = 32
    batch = 8

    weights_t, biases = init_mlp_params(
        k_params, in_channels, num_layers, hidden_channels, std=1.0)
    x = jax.random.normal(k_x, (batch, in_channels), jnp.float32)

    out = mlp_forward_pallas(x, weights_t, biases)
    out = jax.block_until_ready(out)

    ref = jax.block_until_ready(mlp_forward_ref(x, weights_t, biases))
    np.testing.assert_allclose(np.asarray(out), np.asarray(ref),
                               rtol=1e-5, atol=1e-5)

    print("KERNEL_OK")
</pallas_src>

<mosaic_0001>
module attributes {stable_mosaic.version = 11 : i64} {
  func.func @kernel(%arg0: i32, %arg1: memref<8x4xf32, #tpu.memory_space<vmem>>, %arg2: memref<128x128xf32, #tpu.memory_space<vmem>>, %arg3: memref<1x128xf32, #tpu.memory_space<vmem>>, %arg4: memref<128x128xf32, #tpu.memory_space<vmem>>, %arg5: memref<1x128xf32, #tpu.memory_space<vmem>>, %arg6: memref<128x128xf32, #tpu.memory_space<vmem>>, %arg7: memref<8x1xf32, #tpu.memory_space<vmem>>, %arg8: memref<8x128xf32, #tpu.memory_space<vmem>>) attributes {dimension_semantics = [#tpu.dimension_semantics<parallel>], iteration_bounds = array<i64: 1>, scalar_prefetch = 0 : i64, scratch_operands = 1 : i64, tpu.core_type = #tpu.core_type<tc>, window_params = [{transform_indices = @transform_0, window_bounds = array<i64: 8, 4>}, {pipeline_mode = #tpu.pipeline_mode<synchronous>, transform_indices = @transform_1, window_bounds = array<i64: 128, 128>}, {pipeline_mode = #tpu.pipeline_mode<synchronous>, transform_indices = @transform_2, window_bounds = array<i64: 1, 128>}, {pipeline_mode = #tpu.pipeline_mode<synchronous>, transform_indices = @transform_3, window_bounds = array<i64: 128, 128>}, {pipeline_mode = #tpu.pipeline_mode<synchronous>, transform_indices = @transform_4, window_bounds = array<i64: 1, 128>}, {pipeline_mode = #tpu.pipeline_mode<synchronous>, transform_indices = @transform_5, window_bounds = array<i64: 128, 128>}, {transform_indices = @transform_6, window_bounds = array<i64: 8, 1>}]} {
    %cst = arith.constant 0.000000e+00 : f32
    %0 = vector.broadcast %cst : f32 to vector<8x128xf32>
    %c0 = arith.constant 0 : index
    %c0_0 = arith.constant 0 : index
    %1 = vector.load %arg8[%c0, %c0_0] : memref<8x128xf32, #tpu.memory_space<vmem>>, vector<8x128xf32>
    tpu.vector_store %arg8[%c0, %c0_0], %0 {strides = array<i32>} : memref<8x128xf32, #tpu.memory_space<vmem>>, vector<8x128xf32>,
    %c0_1 = arith.constant 0 : index
    %c0_2 = arith.constant 0 : index
    %2 = vector.load %arg1[%c0_1, %c0_2] : memref<8x4xf32, #tpu.memory_space<vmem>>, vector<8x4xf32>
    %c0_3 = arith.constant 0 : index
    %c0_4 = arith.constant 0 : index
    %3 = vector.load %arg8[%c0_3, %c0_4] : memref<8x128xf32, #tpu.memory_space<vmem>>, vector<8x4xf32>
    tpu.vector_store %arg8[%c0_3, %c0_4], %2 {strides = array<i32>} : memref<8x128xf32, #tpu.memory_space<vmem>>, vector<8x4xf32>,
    %c0_5 = arith.constant 0 : index
    %c0_6 = arith.constant 0 : index
    %4 = vector.load %arg8[%c0_5, %c0_6] : memref<8x128xf32, #tpu.memory_space<vmem>>, vector<8x128xf32>
    %c0_7 = arith.constant 0 : index
    %c0_8 = arith.constant 0 : index
    %5 = vector.load %arg2[%c0_7, %c0_8] : memref<128x128xf32, #tpu.memory_space<vmem>>, vector<128x128xf32>
    %cst_9 = arith.constant dense<0.000000e+00> : vector<8x128xf32>
    %6 = tpu.matmul %4, %5, %cst_9 {dimension_numbers = #tpu.dot_dimension_numbers<[1], [0], [0], [1], [0, 0, 1, 1], [], []>} : vector<8x128xf32>, vector<128x128xf32>, vector<8x128xf32> -> vector<8x128xf32>
    %c0_10 = arith.constant 0 : index
    %c0_11 = arith.constant 0 : index
    %7 = vector.load %arg3[%c0_10, %c0_11] : memref<1x128xf32, #tpu.memory_space<vmem>>, vector<1x128xf32>
    %8 = vector.broadcast %7 : vector<1x128xf32> to vector<8x128xf32>
    %9 = arith.addf %6, %8 : vector<8x128xf32>
    %10 = math.tanh %9 : vector<8x128xf32>
    %c0_12 = arith.constant 0 : index
    %c0_13 = arith.constant 0 : index
    %11 = vector.load %arg4[%c0_12, %c0_13] : memref<128x128xf32, #tpu.memory_space<vmem>>, vector<128x128xf32>
    %cst_14 = arith.constant dense<0.000000e+00> : vector<8x128xf32>
    %12 = tpu.matmul %10, %11, %cst_14 {dimension_numbers = #tpu.dot_dimension_numbers<[1], [0], [0], [1], [0, 0, 1, 1], [], []>} : vector<8x128xf32>, vector<128x128xf32>, vector<8x128xf32> -> vector<8x128xf32>
    %c0_15 = arith.constant 0 : index
    %c0_16 = arith.constant 0 : index
    %13 = vector.load %arg5[%c0_15, %c0_16] : memref<1x128xf32, #tpu.memory_space<vmem>>, vector<1x128xf32>
    %14 = vector.broadcast %13 : vector<1x128xf32> to vector<8x128xf32>
    %15 = arith.addf %12, %14 : vector<8x128xf32>
    %16 = math.tanh %15 : vector<8x128xf32>
    %c0_17 = arith.constant 0 : index
    %c0_18 = arith.constant 0 : index
    %17 = vector.load %arg6[%c0_17, %c0_18] : memref<128x128xf32, #tpu.memory_space<vmem>>, vector<128x128xf32>
    %cst_19 = arith.constant dense<0.000000e+00> : vector<8x128xf32>
    %18 = tpu.matmul %16, %17, %cst_19 {dimension_numbers = #tpu.dot_dimension_numbers<[1], [0], [0], [1], [0, 0, 1, 1], [], []>} : vector<8x128xf32>, vector<128x128xf32>, vector<8x128xf32> -> vector<8x128xf32>
    %19 = vector.extract_strided_slice %18 {offsets = [0, 0], sizes = [8, 1], strides = [1, 1]} : vector<8x128xf32> to vector<8x1xf32>
    %c0_20 = arith.constant 0 : index
    %c0_21 = arith.constant 0 : index
    %20 = vector.load %arg7[%c0_20, %c0_21] : memref<8x1xf32, #tpu.memory_space<vmem>>, vector<8x1xf32>
    tpu.vector_store %arg7[%c0_20, %c0_21], %19 {strides = array<i32>} : memref<8x1xf32, #tpu.memory_space<vmem>>, vector<8x1xf32>,
    return
  }
  func.func @transform_0(%arg0: i32) -> (i32, i32) {
    %c0_i32 = arith.constant 0 : i32
    %c0_i32_0 = arith.constant 0 : i32
    return %arg0, %c0_i32 : i32, i32
  }
  func.func @transform_1(%arg0: i32) -> (i32, i32) {
    %c0_i32 = arith.constant 0 : i32
    %c0_i32_0 = arith.constant 0 : i32
    %c0_i32_1 = arith.constant 0 : i32
    return %c0_i32, %c0_i32_0 : i32, i32
  }
  func.func @transform_2(%arg0: i32) -> (i32, i32) {
    %c0_i32 = arith.constant 0 : i32
    %c0_i32_0 = arith.constant 0 : i32
    %c0_i32_1 = arith.constant 0 : i32
    return %c0_i32, %c0_i32_0 : i32, i32
  }
  func.func @transform_3(%arg0: i32) -> (i32, i32) {
    %c0_i32 = arith.constant 0 : i32
    %c0_i32_0 = arith.constant 0 : i32
    %c0_i32_1 = arith.constant 0 : i32
    return %c0_i32, %c0_i32_0 : i32, i32
  }
  func.func @transform_4(%arg0: i32) -> (i32, i32) {
    %c0_i32 = arith.constant 0 : i32
    %c0_i32_0 = arith.constant 0 : i32
    %c0_i32_1 = arith.constant 0 : i32
    return %c0_i32, %c0_i32_0 : i32, i32
  }
  func.func @transform_5(%arg0: i32) -> (i32, i32) {
    %c0_i32 = arith.constant 0 : i32
    %c0_i32_0 = arith.constant 0 : i32
    %c0_i32_1 = arith.constant 0 : i32
    return %c0_i32, %c0_i32_0 : i32, i32
  }
  func.func @transform_6(%arg0: i32) -> (i32, i32) {
    %c0_i32 = arith.constant 0 : i32
    %c0_i32_0 = arith.constant 0 : i32
    return %arg0, %c0_i32 : i32, i32
  }
}

</mosaic_0001>

<bundles_post_ra>
// kernel: tpu_custom_call.1
= control target key start
LH: loop header
LB: loop body
LE: loop exit
PB: predicated region body
PF: predicated region fallthrough
CT: control target
= control target key end

     0   :  { %11 = vsyncpa [#allocation4], 0  ;;  %s702_s0 = inlined_call_operand.vmem [shape: f32[8,4], index: 0, kind: input, shape index: {}]   ;;  %s703_s1 = inlined_call_operand.hbm [shape: f32[128,128], index: 1, kind: input, shape index: {}]   ;;  %s704_s2 = inlined_call_operand.vmem [shape: f32[1,128], index: 2, kind: input, shape index: {}]   ;;  %s705_s3 = inlined_call_operand.hbm [shape: f32[128,128], index: 3, kind: input, shape index: {}]   ;;  %s706_s4 = inlined_call_operand.vmem [shape: f32[1,128], index: 4, kind: input, shape index: {}]   ;;  %s707_s5 = inlined_call_operand.hbm [shape: f32[128,128], index: 5, kind: input, shape index: {}]   ;;  %s708_s6 = inlined_call_operand.vmem [shape: f32[8,1], index: 6, kind: output, shape index: {}]  }
   0x1   :  { %12 = vsyncpa [#allocation6], 0  ;;  %s584_s21 = smov [#allocation5]   ;;  %s585_s23 = smov [#allocation3]  }
   0x2   :  { %s34_s22 = sshll.u32 %s584_s21, 4  ;;  %s20_s24 = sshll.u32 %s585_s23, 4  ;;  %s35_s22 = int_to_ptr.vmem [resolvable:$true] %s34_s22  ;;  %s21_s24 = int_to_ptr.vmem [resolvable:$true] %s20_s24 }
   0x3   :  { %s528_s25 = scalar_lea.vmem %s35_s22, 2048  ;;  %p533_p1 = scmp.lt.s32.totalorder %s35_s22, %s35_s22 }
   0x4   :  { %p529_p0 = scmp.ne.s32.totalorder %s35_s22, %s528_s25  ;;  %p534_p2 = scmp.lt.s32.totalorder %s528_s25, %s528_s25 }
   0x6   :  { %p535_p3 = por %p534_p2, %p533_p1 }
   0x8   :  { %p536_p4 = pnand %p535_p3, %p529_p0 }
   0xa   :  { %539 = shalt.err (!%p536_p4)
}
   0xb   :  { %s586_s26 = smov 128   ;;  %s587_s27 = smov 8  }
   0xc   :  { %40 = dma.hbm_to_vmem [thread:$0]  %s705_s3, 2048, %s35_s22, [#allocation6], %s586_s26, %s586_s26, %s587_s27  }
   0xd   :  { %s548_s30 = scalar_lea.vmem %s21_s24, 2048  ;;  %p553_p6 = scmp.lt.s32.totalorder %s21_s24, %s21_s24 }
   0xe   :  { %p549_p5 = scmp.ne.s32.totalorder %s21_s24, %s548_s30  ;;  %p554_p7 = scmp.lt.s32.totalorder %s548_s30, %s548_s30 }
  0x10   :  { %p555_p8 = por %p554_p7, %p553_p6 }
  0x12   :  { %p556_p9 = pnand %p555_p8, %p549_p5 }
  0x14   :  { %559 = shalt.err (!%p556_p9)
}
  0x15   :  { %26 = dma.hbm_to_vmem [thread:$0]  %s703_s1, 2048, %s21_s24, [#allocation4], %s586_s26, %s586_s26, %s587_s27  }
  0x16   :  { %s588_s9 = smov [#allocation7]  }
  0x17   :  { %s48_s10 = sshll.u32 %s588_s9, 4  ;;  %s49_s10 = int_to_ptr.vmem [resolvable:$true] %s48_s10 }
  0x18   :  { %s568_s11 = scalar_lea.vmem %s49_s10, 2048  ;;  %p573_p11 = scmp.lt.s32.totalorder %s49_s10, %s49_s10 }
  0x19   :  { %p569_p10 = scmp.ne.s32.totalorder %s49_s10, %s568_s11  ;;  %p574_p12 = scmp.lt.s32.totalorder %s568_s11, %s568_s11 }
  0x1b   :  { %p575_p13 = por %p574_p12, %p573_p11 }
  0x1d   :  { %p576_p0 = pnand %p575_p13, %p569_p10 }
  0x1f   :  { %579 = shalt.err (!%p576_p0)
}
  0x20   :  { %54 = dma.hbm_to_vmem [thread:$0]  %s707_s5, 2048, %s49_s10, [#allocation6], %s586_s26, %s586_s26, %s587_s27  }
  0x21   :  { %580 = dma.done.wait [#allocation4], 2048  }
  0x22   :  { %581 = vsyncadd [#allocation4], 4294965248 }
  0x23   :  { %582 = dma.done.wait [#allocation6], 4096  }
  0x24   :  { %583 = vsyncadd [#allocation6], 4294963200  ;;  %v589_v0 = vmov 0.0   ;;  %vm590_vm0 = vmmov 0   ;;  %v84_v1 = vld [vmem:[#allocation3 + $0x78] sm:$0xff]  ;;  %v83_v2 = vld [vmem:[#allocation3 + $0x70] sm:$0xff] }
  0x25   :  { %404 = vmatprep.subr.mxu0 %v589_v0  ;;  %64 = vst [vmem:[#allocation2] sm:$0xff] %v589_v0  ;;  %436 = vmatprep.mubr.msk.f32.mxu0 %vm590_vm0, %v589_v0  ;;  %v82_v3 = vld [vmem:[#allocation3 + $0x68] sm:$0xff]  ;;  %vm66_vm1 = vcmask 31744   ;;  %v81_v4 = vld [vmem:[#allocation3 + $0x60] sm:$0xff]  ;;  %v65_v5 = vld [vmem:[%s702_s0] sm:$0xff]  ;;  %vm343_vm2 = vcmask 7168  }
  0x26   :  { %439 = vmatprep.subr.mxu1 %v589_v0  ;;  %471 = vmatprep.mubr.msk.f32.mxu1 %vm590_vm0, %v589_v0  ;;  %v178_v6 = vld [vmem:[#allocation5 + $0x78] sm:$0xff]  ;;  %67 = vst.msk [vmem:[#allocation2] sm:$0xff] %vm66_vm1, %v65_v5  ;;  %v177_v8 = vld [vmem:[#allocation5 + $0x70] sm:$0xff]  ;;  %v176_v9 = vld [vmem:[#allocation5 + $0x68] sm:$0xff] }
  0x27   :  { %405 = vmatpush3.msra.mxu0 %v84_v1  ;;  %v80_v7 = vld [vmem:[#allocation3 + $0x58] sm:$0xff]  ;;  %440 = vmatpush3.msra.mxu1 %v178_v6  ;;  %v79_v10 = vld [vmem:[#allocation3 + $0x50] sm:$0xff]  ;;  %v175_v11 = vld [vmem:[#allocation5 + $0x60] sm:$0xff] }
  0x28   :  { %406 = vmatprep.subr.mxu0 %v589_v0  ;;  %441 = vmatprep.subr.mxu1 %v589_v0  ;;  %v78_v12 = vld [vmem:[#allocation3 + $0x48] sm:$0xff]  ;;  %v174_v13 = vld [vmem:[#allocation5 + $0x58] sm:$0xff]  ;;  %v77_v14 = vld [vmem:[#allocation3 + $0x40] sm:$0xff] }
  0x29   :  { %407 = vmatpush3.msra.mxu0 %v83_v2  ;;  %442 = vmatpush3.msra.mxu1 %v177_v8  ;;  %v173_v15 = vld [vmem:[#allocation5 + $0x50] sm:$0xff]  ;;  %v76_v16 = vld [vmem:[#allocation3 + $0x38] sm:$0xff]  ;;  %v172_v17 = vld [vmem:[#allocation5 + $0x48] sm:$0xff] }
  0x2a   :  { %408 = vmatprep.subr.mxu0 %v589_v0  ;;  %443 = vmatprep.subr.mxu1 %v589_v0  ;;  %v75_v18 = vld [vmem:[#allocation3 + $0x30] sm:$0xff]  ;;  %v74_v19 = vld [vmem:[#allocation3 + $0x28] sm:$0xff]  ;;  %v73_v20 = vld [vmem:[#allocation3 + $0x20] sm:$0xff] }
  0x2b   :  { %409 = vmatpush3.msra.mxu0 %v82_v3  ;;  %444 = vmatpush3.msra.mxu1 %v176_v9  ;;  %v72_v21 = vld [vmem:[#allocation3 + $0x18] sm:$0xff]  ;;  %v71_v22 = vld [vmem:[#allocation3 + $0x10] sm:$0xff]  ;;  %v70_v23 = vld [vmem:[#allocation3 + $0x8] sm:$0xff] }
  0x2c   :  { %410 = vmatprep.subr.mxu0 %v589_v0  ;;  %445 = vmatprep.subr.mxu1 %v589_v0  ;;  %v69_v24 = vld [vmem:[#allocation3] sm:$0xff]  ;;  %v170_v27 = vld [vmem:[#allocation5 + $0x38] sm:$0xff]  ;;  %v169_v28 = vld [vmem:[#allocation5 + $0x30] sm:$0xff] }
  0x2d   :  { %411 = vmatpush3.msra.mxu0 %v81_v4  ;;  %446 = vmatpush3.msra.mxu1 %v175_v11  ;;  %v68_v25 = vld [vmem:[#allocation2] sm:$0xff]  ;;  %v171_v26 = vld [vmem:[#allocation5 + $0x40] sm:$0xff]  ;;  %v168_v29 = vld [vmem:[#allocation5 + $0x28] sm:$0xff] }
  0x2e   :  { %412 = vmatprep.subr.mxu0 %v589_v0  ;;  %447 = vmatprep.subr.mxu1 %v589_v0  ;;  %v167_v30 = vld [vmem:[#allocation5 + $0x20] sm:$0xff]  ;;  %v166_v31 = vld [vmem:[#allocation5 + $0x18] sm:$0xff]  ;;  %v165_v32 = vld [vmem:[#allocation5 + $0x10] sm:$0xff] }
  0x2f   :  { %413 = vmatpush3.msra.mxu0 %v80_v7  ;;  %448 = vmatpush3.msra.mxu1 %v174_v13  ;;  %v164_v33 = vld [vmem:[#allocation5 + $0x8] sm:$0xff]  ;;  %v163_v34 = vld [vmem:[#allocation5] sm:$0xff]  ;;  %v272_v35 = vld [vmem:[#allocation7 + $0x78] sm:$0xff] }
  0x30   :  { %414 = vmatprep.subr.mxu0 %v589_v0  ;;  %449 = vmatprep.subr.mxu1 %v589_v0  ;;  %v271_v36 = vld [vmem:[#allocation7 + $0x70] sm:$0xff]  ;;  %v270_v37 = vld [vmem:[#allocation7 + $0x68] sm:$0xff]  ;;  %v269_v38 = vld [vmem:[#allocation7 + $0x60] sm:$0xff] }
  0x31   :  { %415 = vmatpush3.msra.mxu0 %v79_v10  ;;  %450 = vmatpush3.msra.mxu1 %v173_v15  ;;  %v268_v39 = vld [vmem:[#allocation7 + $0x58] sm:$0xff]  ;;  %v267_v40 = vld [vmem:[#allocation7 + $0x50] sm:$0xff]  ;;  %v266_v41 = vld [vmem:[#allocation7 + $0x48] sm:$0xff] }
  0x32   :  { %416 = vmatprep.subr.mxu0 %v589_v0  ;;  %451 = vmatprep.subr.mxu1 %v589_v0  ;;  %v351_v42 = vld [vmem:[%s704_s2] ss:$0 sm:$0xff]  ;;  %v265_v47 = vld [vmem:[#allocation7 + $0x40] sm:$0xff]  ;;  %v263_v49 = vld [vmem:[#allocation7 + $0x30] sm:$0xff] }
  0x33   :  { %417 = vmatpush3.msra.mxu0 %v78_v12  ;;  %452 = vmatpush3.msra.mxu1 %v172_v17  ;;  %v264_v48 = vld [vmem:[#allocation7 + $0x38] sm:$0xff]  ;;  %v262_v50 = vld [vmem:[#allocation7 + $0x28] sm:$0xff]  ;;  %v261_v51 = vld [vmem:[#allocation7 + $0x20] sm:$0xff] }
  0x34   :  { %418 = vmatprep.subr.mxu0 %v589_v0  ;;  %453 = vmatprep.subr.mxu1 %v589_v0  ;;  %v260_v52 = vld [vmem:[#allocation7 + $0x18] sm:$0xff]  ;;  %v259_v53 = vld [vmem:[#allocation7 + $0x10] sm:$0xff]  ;;  %v258_v54 = vld [vmem:[#allocation7 + $0x8] sm:$0xff] }
  0x35   :  { %419 = vmatpush3.msra.mxu0 %v77_v14  ;;  %454 = vmatpush3.msra.mxu1 %v171_v26  ;;  %v257_v55 = vld [vmem:[#allocation7] sm:$0xff]  ;;  %v352_v56 = vld [vmem:[%s706_s4] ss:$0 sm:$0xff] }
  0x36   :  { %420 = vmatprep.subr.mxu0 %v589_v0  ;;  %455 = vmatprep.subr.mxu1 %v589_v0 }
  0x37   :  { %421 = vmatpush3.msra.mxu0 %v76_v16  ;;  %456 = vmatpush3.msra.mxu1 %v170_v27 }
  0x38   :  { %422 = vmatprep.subr.mxu0 %v589_v0  ;;  %457 = vmatprep.subr.mxu1 %v589_v0 }
  0x39   :  { %423 = vmatpush3.msra.mxu0 %v75_v18  ;;  %458 = vmatpush3.msra.mxu1 %v169_v28 }
  0x3a   :  { %424 = vmatprep.subr.mxu0 %v589_v0  ;;  %459 = vmatprep.subr.mxu1 %v589_v0 }
  0x3b   :  { %425 = vmatpush3.msra.mxu0 %v74_v19  ;;  %460 = vmatpush3.msra.mxu1 %v168_v29 }
  0x3c   :  { %426 = vmatprep.subr.mxu0 %v589_v0  ;;  %461 = vmatprep.subr.mxu1 %v589_v0 }
  0x3d   :  { %427 = vmatpush3.msra.mxu0 %v73_v20  ;;  %462 = vmatpush3.msra.mxu1 %v167_v30 }
  0x3e   :  { %428 = vmatprep.subr.mxu0 %v589_v0  ;;  %463 = vmatprep.subr.mxu1 %v589_v0 }
  0x3f   :  { %429 = vmatpush3.msra.mxu0 %v72_v21  ;;  %464 = vmatpush3.msra.mxu1 %v166_v31 }
  0x40   :  { %430 = vmatprep.subr.mxu0 %v589_v0  ;;  %465 = vmatprep.subr.mxu1 %v589_v0 }
  0x41   :  { %431 = vmatpush3.msra.mxu0 %v71_v22  ;;  %466 = vmatpush3.msra.mxu1 %v165_v32 }
  0x42   :  { %432 = vmatprep.subr.mxu0 %v589_v0  ;;  %467 = vmatprep.subr.mxu1 %v589_v0 }
  0x43   :  { %433 = vmatpush3.msra.mxu0 %v70_v23  ;;  %468 = vmatpush3.msra.mxu1 %v164_v33 }
  0x44   :  { %434 = vmatprep.subr.mxu0 %v589_v0  ;;  %469 = vmatprep.subr.mxu1 %v589_v0 }
  0x45   :  { %435 = vmatpush3.msra.mxu0 %v69_v24  ;;  %470 = vmatpush3.msra.mxu1 %v163_v34 }
  0x46   :  { %437 = vmatmul.mubr.f32.vlgmr.msra.gmra.mxu0 %v68_v25  ;;  %474 = vmatprep.subr.mxu0 %v589_v0 }
  0x47   :  { %506 = vmatprep.mubr.msk.f32.mxu0 %vm590_vm0, %v589_v0  ;;  %475 = vmatpush3.msra.mxu0 %v272_v35 }
  0x48   :  { %476 = vmatprep.subr.mxu0 %v589_v0 }
  0x49   :  { %477 = vmatpush3.msra.mxu0 %v271_v36 }
  0x4a   :  { %478 = vmatprep.subr.mxu0 %v589_v0 }
  0x4b   :  { %479 = vmatpush3.msra.mxu0 %v270_v37 }
  0x4c   :  { %480 = vmatprep.subr.mxu0 %v589_v0 }
  0x4d   :  { %481 = vmatpush3.msra.mxu0 %v269_v38 }
  0x4e   :  { %482 = vmatprep.subr.mxu0 %v589_v0 }
  0x4f   :  { %483 = vmatpush3.msra.mxu0 %v268_v39 }
  0x50   :  { %484 = vmatprep.subr.mxu0 %v589_v0 }
  0x51   :  { %485 = vmatpush3.msra.mxu0 %v267_v40 }
  0x52   :  { %486 = vmatprep.subr.mxu0 %v589_v0 }
  0x53   :  { %487 = vmatpush3.msra.mxu0 %v266_v41 }
  0x54   :  { %488 = vmatprep.subr.mxu0 %v589_v0 }
  0x55   :  { %489 = vmatpush3.msra.mxu0 %v265_v47 }
  0x56   :  { %490 = vmatprep.subr.mxu0 %v589_v0 }
  0x57   :  { %491 = vmatpush3.msra.mxu0 %v264_v48 }
  0x58   :  { %492 = vmatprep.subr.mxu0 %v589_v0 }
  0x59   :  { %493 = vmatpush3.msra.mxu0 %v263_v49 }
  0x5a   :  { %494 = vmatprep.subr.mxu0 %v589_v0 }
  0x5b   :  { %495 = vmatpush3.msra.mxu0 %v262_v50 }
  0x5c   :  { %496 = vmatprep.subr.mxu0 %v589_v0 }
  0x5d   :  { %497 = vmatpush3.msra.mxu0 %v261_v51 }
  0x5e   :  { %498 = vmatprep.subr.mxu0 %v589_v0 }
  0x5f   :  { %499 = vmatpush3.msra.mxu0 %v260_v52 }
  0x60   :  { %500 = vmatprep.subr.mxu0 %v589_v0 }
  0x61   :  { %501 = vmatpush3.msra.mxu0 %v259_v53 }
  0x62   :  { %502 = vmatprep.subr.mxu0 %v589_v0 }
  0x63   :  { %503 = vmatpush3.msra.mxu0 %v258_v54 }
  0x64   :  { %504 = vmatprep.subr.mxu0 %v589_v0 }
  0x65   :  { %505 = vmatpush3.msra.mxu0 %v257_v55 }
 0x106   :  { %v158_v43 = vpop.f32.mrf.mxu0 }
 0x107   :  { %v159_v44 = vadd.f32 %v351_v42, %v158_v43 }
 0x108   :  { %v438_v45 = vpop.f32.mrf.mxu0 }
 0x109   :  { %516 = vtanh.f32 %v159_v44 }
 0x116   :  { %v517_v46 = vpop.eup %516 }
 0x117   :  { %472 = vmatmul.mubr.f32.vlgmr.msra.gmra.mxu1 %v517_v46 }
 0x1d7   :  { %v252_v57 = vpop.f32.mrf.mxu1 }
 0x1d8   :  { %v253_v58 = vadd.f32 %v352_v56, %v252_v57 }
 0x1d9   :  { %v473_v59 = vpop.f32.mrf.mxu1 }
 0x1da   :  { %518 = vtanh.f32 %v253_v58 }
 0x1e7   :  { %v519_v60 = vpop.eup %518 }
 0x1e8   :  { %507 = vmatmul.mubr.f32.vlgmr.msra.gmra.mxu0 %v519_v60 }
 0x2a8   :  { %v339_v61 = vpop.f32.mrf.mxu0 }
 0x2a9   :  { %344 = vst.msk [vmem:[%s708_s6] sm:$0xff] %vm343_vm2, %v339_v61 }
 0x2aa   :  { %v508_v62 = vpop.f32.mrf.mxu0 }
 0x2ab   :  { %349 = vsyncpa [#allocation4], 1 }
 0x2ac   :  { %350 = vsyncpa [#allocation6], 1 }

</bundles_post_ra>
